<compile_context>
chip_gen: v6e
topology: v6e:2x2x1
jax: 0.10.0
libtpu: 0.0.40
codegen_flags: <defaults>
</compile_context>

<pallas_src>
import functools

import jax
import jax.numpy as jnp
import numpy as np
from jax.experimental import pallas as pl
from jax.experimental.pallas import tpu as pltpu


def _clip_loss_kernel(scale_ref, img_ref, txt_ref, out_ref,
                      colsum_ref, rowlse_ref, diag_ref, *,
                      mxu_dtype, tq, batch):
    i = pl.program_id(0)
    scale = scale_ref[0, 0]                          # exp(logit_scale)

    @pl.when(i == 0)
    def _init():
        colsum_ref[...] = jnp.zeros_like(colsum_ref)
        rowlse_ref[...] = jnp.zeros_like(rowlse_ref)
        diag_ref[...] = jnp.zeros_like(diag_ref)

    # Sum-of-squares + rsqrt in f32 regardless of input dtype.
    img = img_ref[...].astype(jnp.float32)           # (tq, D) row block
    txt = txt_ref[...].astype(jnp.float32)           # (B, D), resident

    inv_img = jax.lax.rsqrt(jnp.sum(img * img, axis=-1, keepdims=True))
    inv_txt = jax.lax.rsqrt(jnp.sum(txt * txt, axis=-1, keepdims=True))
    img_n = img * (inv_img * scale)                  # exp(logit_scale) folded in
    txt_n = txt * inv_txt

    # Diagonal logits of this row block straight from the features (no BxB
    # iota/mask).  NOTE: with mxu_dtype=bf16 this diag is f32-exact while the
    # logsumexp below uses bf16-rounded logits — tiny documented bias.
    start = pl.multiple_of(i * tq, tq)
    txt_d = txt_ref[pl.ds(start, tq), :].astype(jnp.float32)
    inv_d = jax.lax.rsqrt(jnp.sum(txt_d * txt_d, axis=-1, keepdims=True))
    diag_ref[...] += jnp.sum(img_n * (txt_d * inv_d), keepdims=True)   # (1,1)

    # (tq, B) scaled logits: contract dim 1 of both operands — no transpose.
    logits = jax.lax.dot_general(
        img_n.astype(mxu_dtype), txt_n.astype(mxu_dtype),
        dimension_numbers=(((1,), (1,)), ((), ())),
        preferred_element_type=jnp.float32)

    # Single exp pass with a fixed shift: rows are unit-norm so |logits| <=
    # scale, hence exp(logits - scale) in (exp(-2*scale), 1] — no overflow and
    # no harmful underflow for any sane (clamped) logit_scale.
    p = jnp.exp(logits - scale)                                        # (tq, B)
    rowlse_ref[...] += jnp.sum(
        scale + jnp.log(jnp.sum(p, axis=1, keepdims=True)), keepdims=True)
    colsum_ref[...] += jnp.sum(p, axis=0, keepdims=True)               # (1, B)

    @pl.when(i == pl.num_programs(0) - 1)
    def _finalize():
        lse_col = jnp.sum(scale + jnp.log(colsum_ref[...]), keepdims=True)
        dsum = diag_ref[...]
        out_ref[...] = ((rowlse_ref[...] - dsum) +
                        (lse_col - dsum)) * (0.5 / batch)


def clip_loss_1d(image_features, text_features, logit_scale, *,
                 mxu_dtype=jnp.bfloat16, block_rows=None):
    """Pallas CLIPLoss1D forward.

    image_features, text_features: (B, D). logit_scale: scalar (pre-exp).
    mxu_dtype: dtype fed to the MXU. bf16 by default (MXU-native on
    v5e/v6e/v7x, f32 accumulate); pass jnp.float32 for bit-tight testing.
    """
    B, D = image_features.shape
    assert text_features.shape == (B, D)

    # Hoist exp(logit_scale) out of the kernel.
    scale = jnp.exp(jnp.asarray(logit_scale, jnp.float32)).reshape(1, 1)

    # Row-block size: a multiple of 8 dividing B, else the whole batch.
    if block_rows is None:
        tq = B
        if B > 256:
            for cand in (256, 128, 64, 32, 16, 8):
                if B % cand == 0:
                    tq = cand
                    break
    else:
        tq = block_rows
    assert B % tq == 0, "batch must be divisible by the row-block size"
    nb = B // tq

    # Scoped-VMEM budget: per-step footprint (resident text + double-buffered
    # image block + logits/exp temps), capped by the real device VMEM minus
    # headroom (v7x has only 64 MiB physical per core).
    est = 4 * (2 * B * D + 2 * tq * D + 3 * tq * B + B + 64)
    try:
        vmem_cap = int(pltpu.get_tpu_info().vmem_capacity_bytes)
    except Exception:  # pragma: no cover - conservative fallback
        vmem_cap = 64 << 20
    vmem_limit = int(min(max(est + (4 << 20), 16 << 20),
                         max(vmem_cap - (8 << 20), 16 << 20)))

    itemsize = jnp.dtype(image_features.dtype).itemsize
    cost = pl.CostEstimate(
        flops=2 * B * B * D + 8 * B * D,
        transcendentals=B * B + 4 * B,
        bytes_accessed=2 * B * D * itemsize + 4,
    )

    kernel = functools.partial(_clip_loss_kernel,
                               mxu_dtype=mxu_dtype, tq=tq, batch=B)
    out = pl.pallas_call(
        kernel,
        out_shape=jax.ShapeDtypeStruct((1, 1), jnp.float32),
        grid_spec=pltpu.PrefetchScalarGridSpec(
            num_scalar_prefetch=0,
            grid=(nb,),
            in_specs=[
                pl.BlockSpec((1, 1), lambda i: (0, 0),
                             memory_space=pltpu.MemorySpace.SMEM),  # exp(scale)
                pl.BlockSpec((tq, D), lambda i: (i, 0)),            # image rows
                pl.BlockSpec((B, D), lambda i: (0, 0)),             # text (resident)
            ],
            out_specs=pl.BlockSpec((1, 1), lambda i: (0, 0)),
            scratch_shapes=[
                pltpu.VMEM((1, B), jnp.float32),   # column exp-sum accumulator
                pltpu.VMEM((1, 1), jnp.float32),   # sum of row logsumexps
                pltpu.VMEM((1, 1), jnp.float32),   # sum of diagonal logits
            ],
        ),
        compiler_params=pltpu.CompilerParams(
            dimension_semantics=("arbitrary",),
            vmem_limit_bytes=vmem_limit),
        cost_estimate=cost,
    )(scale, image_features, text_features)
    return out[0, 0]


def clip_loss_1d_ref(image_features, text_features, logit_scale):
    """Pure-JAX reference mirroring the PyTorch module."""
    img = image_features / jnp.linalg.norm(image_features, axis=-1, keepdims=True)
    txt = text_features / jnp.linalg.norm(text_features, axis=-1, keepdims=True)
    scale = jnp.exp(logit_scale)
    li = scale * img @ txt.T
    lt = scale * txt @ img.T
    B = img.shape[0]
    gt = jnp.arange(B)

    def ce(logits):
        lse = jax.scipy.special.logsumexp(logits, axis=-1)
        return jnp.mean(lse - logits[jnp.arange(B), gt])

    return (ce(li) + ce(lt)) / 2.0


if __name__ == "__main__":
    # Deterministic parameter init (matches nn.Parameter(ones([]) * log(1/0.07))).
    logit_scale = jnp.float32(np.log(1.0 / 0.07))

    # Small synthetic inputs: batch=8, hidden=32.
    key = jax.random.PRNGKey(0)
    k1, k2 = jax.random.split(key)
    image_features = jax.random.normal(k1, (8, 32), dtype=jnp.float32)
    text_features = jax.random.normal(k2, (8, 32), dtype=jnp.float32)

    ref = clip_loss_1d_ref(image_features, text_features, logit_scale)

    # Default fast path: bf16 MXU operands, f32 accumulate.
    loss_bf16 = jax.block_until_ready(
        clip_loss_1d(image_features, text_features, logit_scale))
    np.testing.assert_allclose(np.asarray(loss_bf16), np.asarray(ref),
                               rtol=5e-2, atol=5e-2)

    # Opt-in f32 MXU path for tight agreement with the reference.
    loss_f32 = jax.block_until_ready(
        clip_loss_1d(image_features, text_features, logit_scale,
                     mxu_dtype=jnp.float32))
    np.testing.assert_allclose(np.asarray(loss_f32), np.asarray(ref),
                               rtol=2e-4, atol=1e-4)

    print("KERNEL_OK")
</pallas_src>

<mosaic_0001>
module attributes {stable_mosaic.version = 11 : i64} {
  func.func @_clip_loss_kernel(%arg0: i32, %arg1: memref<1x1xf32, #tpu.memory_space<smem>>, %arg2: memref<8x32xf32, #tpu.memory_space<vmem>>, %arg3: memref<8x32xf32, #tpu.memory_space<vmem>>, %arg4: memref<1x1xf32, #tpu.memory_space<vmem>>, %arg5: memref<1x8xf32, #tpu.memory_space<vmem>>, %arg6: memref<1x1xf32, #tpu.memory_space<vmem>>, %arg7: memref<1x1xf32, #tpu.memory_space<vmem>>) attributes {dimension_semantics = [#tpu.dimension_semantics<arbitrary>], iteration_bounds = array<i64: 1>, scalar_prefetch = 0 : i64, scratch_operands = 3 : i64, tpu.core_type = #tpu.core_type<tc>, window_params = [{transform_indices = @transform_0, window_bounds = array<i64: 1, 1>}, {transform_indices = @transform_1, window_bounds = array<i64: 8, 32>}, {pipeline_mode = #tpu.pipeline_mode<synchronous>, transform_indices = @transform_2, window_bounds = array<i64: 8, 32>}, {pipeline_mode = #tpu.pipeline_mode<synchronous>, transform_indices = @transform_3, window_bounds = array<i64: 1, 1>}]} {
    %c0 = arith.constant 0 : index
    %c0_0 = arith.constant 0 : index
    %0 = memref.load %arg1[%c0, %c0_0] : memref<1x1xf32, #tpu.memory_space<smem>>
    %c0_i32 = arith.constant 0 : i32
    %1 = arith.cmpi eq, %arg0, %c0_i32 : i32
    %2 = arith.extui %1 : i1 to i32
    %c0_i32_1 = arith.constant 0 : i32
    %3 = arith.cmpi ne, %2, %c0_i32_1 : i32
    scf.if %3 {
      %cst_28 = arith.constant 0.000000e+00 : f32
      %66 = vector.broadcast %cst_28 : f32 to vector<1x8xf32>
      %c0_29 = arith.constant 0 : index
      %c0_30 = arith.constant 0 : index
      %67 = vector.load %arg5[%c0_29, %c0_30] : memref<1x8xf32, #tpu.memory_space<vmem>>, vector<1x8xf32>
      tpu.vector_store %arg5[%c0_29, %c0_30], %66 {strides = array<i32>} : memref<1x8xf32, #tpu.memory_space<vmem>>, vector<1x8xf32>,
      %cst_31 = arith.constant 0.000000e+00 : f32
      %68 = vector.broadcast %cst_31 : f32 to vector<1x1xf32>
      %c0_32 = arith.constant 0 : index
      %c0_33 = arith.constant 0 : index
      %69 = vector.load %arg6[%c0_32, %c0_33] : memref<1x1xf32, #tpu.memory_space<vmem>>, vector<1x1xf32>
      tpu.vector_store %arg6[%c0_32, %c0_33], %68 {strides = array<i32>} : memref<1x1xf32, #tpu.memory_space<vmem>>, vector<1x1xf32>,
      %cst_34 = arith.constant 0.000000e+00 : f32
      %70 = vector.broadcast %cst_34 : f32 to vector<1x1xf32>
      %c0_35 = arith.constant 0 : index
      %c0_36 = arith.constant 0 : index
      %71 = vector.load %arg7[%c0_35, %c0_36] : memref<1x1xf32, #tpu.memory_space<vmem>>, vector<1x1xf32>
      tpu.vector_store %arg7[%c0_35, %c0_36], %70 {strides = array<i32>} : memref<1x1xf32, #tpu.memory_space<vmem>>, vector<1x1xf32>,
    } else {
    }
    %c0_2 = arith.constant 0 : index
    %c0_3 = arith.constant 0 : index
    %4 = vector.load %arg2[%c0_2, %c0_3] : memref<8x32xf32, #tpu.memory_space<vmem>>, vector<8x32xf32>
    %c0_4 = arith.constant 0 : index
    %c0_5 = arith.constant 0 : index
    %5 = vector.load %arg3[%c0_4, %c0_5] : memref<8x32xf32, #tpu.memory_space<vmem>>, vector<8x32xf32>
    %6 = arith.mulf %4, %4 : vector<8x32xf32>
    %cst = arith.constant dense<0.000000e+00> : vector<8xf32>
    %7 = vector.multi_reduction <add>, %6, %cst [1] : vector<8x32xf32> to vector<8xf32>
    %8 = vector.shape_cast %7 : vector<8xf32> to vector<8x1xf32>
    %9 = math.rsqrt %8 : vector<8x1xf32>
    %10 = arith.mulf %5, %5 : vector<8x32xf32>
    %cst_6 = arith.constant dense<0.000000e+00> : vector<8xf32>
    %11 = vector.multi_reduction <add>, %10, %cst_6 [1] : vector<8x32xf32> to vector<8xf32>
    %12 = vector.shape_cast %11 : vector<8xf32> to vector<8x1xf32>
    %13 = math.rsqrt %12 : vector<8x1xf32>
    %14 = vector.broadcast %0 : f32 to vector<8x1xf32>
    %15 = arith.mulf %9, %14 : vector<8x1xf32>
    %16 = vector.broadcast %15 : vector<8x1xf32> to vector<8x32xf32>
    %17 = arith.mulf %4, %16 : vector<8x32xf32>
    %18 = vector.broadcast %13 : vector<8x1xf32> to vector<8x32xf32>
    %19 = arith.mulf %5, %18 : vector<8x32xf32>
    %c8_i32 = arith.constant 8 : i32
    %20 = arith.muli %arg0, %c8_i32 : i32
    %21 = tpu.assume_multiple %20, 8 : i32
    %22 = arith.index_cast %21 : i32 to index
    %c0_7 = arith.constant 0 : index
    %23 = vector.load %arg3[%22, %c0_7] : memref<8x32xf32, #tpu.memory_space<vmem>>, vector<8x32xf32>
    %24 = arith.mulf %23, %23 : vector<8x32xf32>
    %cst_8 = arith.constant dense<0.000000e+00> : vector<8xf32>
    %25 = vector.multi_reduction <add>, %24, %cst_8 [1] : vector<8x32xf32> to vector<8xf32>
    %26 = vector.shape_cast %25 : vector<8xf32> to vector<8x1xf32>
    %27 = math.rsqrt %26 : vector<8x1xf32>
    %c0_9 = arith.constant 0 : index
    %c0_10 = arith.constant 0 : index
    %28 = vector.load %arg7[%c0_9, %c0_10] : memref<1x1xf32, #tpu.memory_space<vmem>>, vector<1x1xf32>
    %29 = vector.broadcast %27 : vector<8x1xf32> to vector<8x32xf32>
    %30 = arith.mulf %23, %29 : vector<8x32xf32>
    %31 = arith.mulf %17, %30 : vector<8x32xf32>
    %32 = vector.shape_cast %31 : vector<8x32xf32> to vector<1x8x32xf32>
    %cst_11 = arith.constant dense<0.000000e+00> : vector<1xf32>
    %33 = vector.multi_reduction <add>, %32, %cst_11 [1, 2] : vector<1x8x32xf32> to vector<1xf32>
    %34 = vector.shape_cast %33 : vector<1xf32> to vector<1x1x1xf32>
    %35 = vector.extract %34[0, 0, 0] : f32 from vector<1x1x1xf32>
    %36 = vector.broadcast %35 : f32 to vector<1x1xf32>
    %37 = arith.addf %28, %36 : vector<1x1xf32>
    %c0_12 = arith.constant 0 : index
    %c0_13 = arith.constant 0 : index
    %38 = vector.load %arg7[%c0_12, %c0_13] : memref<1x1xf32, #tpu.memory_space<vmem>>, vector<1x1xf32>
    tpu.vector_store %arg7[%c0_12, %c0_13], %37 {strides = array<i32>} : memref<1x1xf32, #tpu.memory_space<vmem>>, vector<1x1xf32>,
    %39 = arith.truncf %17 : vector<8x32xf32> to vector<8x32xbf16>
    %40 = arith.truncf %19 : vector<8x32xf32> to vector<8x32xbf16>
    %cst_14 = arith.constant dense<0.000000e+00> : vector<8x8xf32>
    %41 = tpu.matmul %39, %40, %cst_14 {dimension_numbers = #tpu.dot_dimension_numbers<[1], [1], [0], [0], [0, 0, 1, 0], [], []>} : vector<8x32xbf16>, vector<8x32xbf16>, vector<8x8xf32> -> vector<8x8xf32>
    %42 = vector.broadcast %0 : f32 to vector<8x8xf32>
    %43 = arith.subf %41, %42 : vector<8x8xf32>
    %44 = math.exp %43 : vector<8x8xf32>
    %c0_15 = arith.constant 0 : index
    %c0_16 = arith.constant 0 : index
    %45 = vector.load %arg6[%c0_15, %c0_16] : memref<1x1xf32, #tpu.memory_space<vmem>>, vector<1x1xf32>
    %cst_17 = arith.constant dense<0.000000e+00> : vector<8xf32>
    %46 = vector.multi_reduction <add>, %44, %cst_17 [1] : vector<8x8xf32> to vector<8xf32>
    %47 = vector.shape_cast %46 : vector<8xf32> to vector<8x1xf32>
    %48 = math.log %47 : vector<8x1xf32>
    %49 = vector.broadcast %0 : f32 to vector<8x1xf32>
    %50 = arith.addf %49, %48 : vector<8x1xf32>
    %51 = vector.shape_cast %50 : vector<8x1xf32> to vector<1x8x1xf32>
    %cst_18 = arith.constant dense<0.000000e+00> : vector<1xf32>
    %52 = vector.multi_reduction <add>, %51, %cst_18 [1, 2] : vector<1x8x1xf32> to vector<1xf32>
    %53 = vector.shape_cast %52 : vector<1xf32> to vector<1x1x1xf32>
    %54 = vector.extract %53[0, 0, 0] : f32 from vector<1x1x1xf32>
    %55 = vector.broadcast %54 : f32 to vector<1x1xf32>
    %56 = arith.addf %45, %55 : vector<1x1xf32>
    %c0_19 = arith.constant 0 : index
    %c0_20 = arith.constant 0 : index
    %57 = vector.load %arg6[%c0_19, %c0_20] : memref<1x1xf32, #tpu.memory_space<vmem>>, vector<1x1xf32>
    tpu.vector_store %arg6[%c0_19, %c0_20], %56 {strides = array<i32>} : memref<1x1xf32, #tpu.memory_space<vmem>>, vector<1x1xf32>,
    %c0_21 = arith.constant 0 : index
    %c0_22 = arith.constant 0 : index
    %58 = vector.load %arg5[%c0_21, %c0_22] : memref<1x8xf32, #tpu.memory_space<vmem>>, vector<1x8xf32>
    %cst_23 = arith.constant dense<0.000000e+00> : vector<8xf32>
    %59 = vector.multi_reduction <add>, %44, %cst_23 [0] : vector<8x8xf32> to vector<8xf32>
    %60 = vector.shape_cast %59 : vector<8xf32> to vector<1x8xf32>
    %61 = arith.addf %58, %60 : vector<1x8xf32>
    %c0_24 = arith.constant 0 : index
    %c0_25 = arith.constant 0 : index
    %62 = vector.load %arg5[%c0_24, %c0_25] : memref<1x8xf32, #tpu.memory_space<vmem>>, vector<1x8xf32>
    tpu.vector_store %arg5[%c0_24, %c0_25], %61 {strides = array<i32>} : memref<1x8xf32, #tpu.memory_space<vmem>>, vector<1x8xf32>,
    %c0_i32_26 = arith.constant 0 : i32
    %63 = arith.cmpi eq, %arg0, %c0_i32_26 : i32
    %64 = arith.extui %63 : i1 to i32
    %c0_i32_27 = arith.constant 0 : i32
    %65 = arith.cmpi ne, %64, %c0_i32_27 : i32
    scf.if %65 {
      %c0_28 = arith.constant 0 : index
      %c0_29 = arith.constant 0 : index
      %66 = vector.load %arg5[%c0_28, %c0_29] : memref<1x8xf32, #tpu.memory_space<vmem>>, vector<1x8xf32>
      %67 = math.log %66 : vector<1x8xf32>
      %68 = vector.broadcast %0 : f32 to vector<1x8xf32>
      %69 = arith.addf %68, %67 : vector<1x8xf32>
      %70 = vector.shape_cast %69 : vector<1x8xf32> to vector<1x1x8xf32>
      %cst_30 = arith.constant dense<0.000000e+00> : vector<1xf32>
      %71 = vector.multi_reduction <add>, %70, %cst_30 [1, 2] : vector<1x1x8xf32> to vector<1xf32>
      %72 = vector.shape_cast %71 : vector<1xf32> to vector<1x1x1xf32>
      %73 = vector.extract %72[0, 0, 0] : f32 from vector<1x1x1xf32>
      %74 = vector.broadcast %73 : f32 to vector<1x1xf32>
      %c0_31 = arith.constant 0 : index
      %c0_32 = arith.constant 0 : index
      %75 = vector.load %arg7[%c0_31, %c0_32] : memref<1x1xf32, #tpu.memory_space<vmem>>, vector<1x1xf32>
      %c0_33 = arith.constant 0 : index
      %c0_34 = arith.constant 0 : index
      %76 = vector.load %arg6[%c0_33, %c0_34] : memref<1x1xf32, #tpu.memory_space<vmem>>, vector<1x1xf32>
      %77 = arith.subf %76, %75 : vector<1x1xf32>
      %78 = arith.subf %74, %75 : vector<1x1xf32>
      %79 = arith.addf %77, %78 : vector<1x1xf32>
      %cst_35 = arith.constant 6.250000e-02 : f32
      %80 = vector.broadcast %cst_35 : f32 to vector<1x1xf32>
      %81 = arith.mulf %79, %80 : vector<1x1xf32>
      %c0_36 = arith.constant 0 : index
      %c0_37 = arith.constant 0 : index
      %82 = vector.load %arg4[%c0_36, %c0_37] : memref<1x1xf32, #tpu.memory_space<vmem>>, vector<1x1xf32>
      tpu.vector_store %arg4[%c0_36, %c0_37], %81 {strides = array<i32>} : memref<1x1xf32, #tpu.memory_space<vmem>>, vector<1x1xf32>,
    } else {
    }
    return
  }
  func.func @transform_0(%arg0: i32) -> (i32, i32) {
    %c0_i32 = arith.constant 0 : i32
    %c0_i32_0 = arith.constant 0 : i32
    %c0_i32_1 = arith.constant 0 : i32
    return %c0_i32, %c0_i32_0 : i32, i32
  }
  func.func @transform_1(%arg0: i32) -> (i32, i32) {
    %c0_i32 = arith.constant 0 : i32
    %c0_i32_0 = arith.constant 0 : i32
    return %arg0, %c0_i32 : i32, i32
  }
  func.func @transform_2(%arg0: i32) -> (i32, i32) {
    %c0_i32 = arith.constant 0 : i32
    %c0_i32_0 = arith.constant 0 : i32
    %c0_i32_1 = arith.constant 0 : i32
    return %c0_i32, %c0_i32_0 : i32, i32
  }
  func.func @transform_3(%arg0: i32) -> (i32, i32) {
    %c0_i32 = arith.constant 0 : i32
    %c0_i32_0 = arith.constant 0 : i32
    %c0_i32_1 = arith.constant 0 : i32
    return %c0_i32, %c0_i32_0 : i32, i32
  }
}

</mosaic_0001>

<bundles_post_ra>
// kernel: tpu_custom_call.1
= control target key start
LH: loop header
LB: loop body
LE: loop exit
PB: predicated region body
PF: predicated region fallthrough
CT: control target
= control target key end

     0   :  { %9 = vsyncpa [#allocation7], 0  ;;  %s371_s0 = inlined_call_operand.<no memory space> [shape: f32[1,1], index: 0, kind: input, shape index: {}]   ;;  %s372_s1 = inlined_call_operand.hbm [shape: f32[8,32], index: 1, kind: input, shape index: {}]   ;;  %s373_s2 = inlined_call_operand.hbm [shape: f32[8,32], index: 2, kind: input, shape index: {}]   ;;  %s374_s3 = inlined_call_operand.hbm [shape: f32[1,1], index: 3, kind: output, shape index: {}]  }
   0x1   :  { %10 = vsyncpa [#allocation10], 0 }
   0x2   :  { %11 = vsyncpa [#allocation8], 0  ;;  %s315_s12 = smov [#allocation6]   ;;  %s316_s14 = smov [#allocation9]  }
   0x3   :  { %s20_s13 = sshll.u32 %s315_s12, 4  ;;  %s30_s15 = sshll.u32 %s316_s14, 4  ;;  %s21_s13 = int_to_ptr.vmem [resolvable:$true] %s20_s13  ;;  %s31_s15 = int_to_ptr.vmem [resolvable:$true] %s30_s15 }
   0x4   :  { %s257_s16 = scalar_lea.vmem %s21_s13, 128  ;;  %p262_p1 = scmp.lt.s32.totalorder %s21_s13, %s21_s13 }
   0x5   :  { %p258_p0 = scmp.ne.s32.totalorder %s21_s13, %s257_s16  ;;  %p263_p2 = scmp.lt.s32.totalorder %s257_s16, %s257_s16 }
   0x7   :  { %p264_p3 = por %p263_p2, %p262_p1 }
   0x9   :  { %p265_p4 = pnand %p264_p3, %p258_p0 }
   0xb   :  { %268 = shalt.err (!%p265_p4)
}
   0xc   :  { %23 = dma.hbm_to_vmem [thread:$0]  %s372_s1, 128, %s21_s13, [#allocation7]  }
   0xd   :  { %s277_s19 = scalar_lea.vmem %s31_s15, 128  ;;  %p282_p6 = scmp.lt.s32.totalorder %s31_s15, %s31_s15 }
   0xe   :  { %p278_p5 = scmp.ne.s32.totalorder %s31_s15, %s277_s19  ;;  %p283_p7 = scmp.lt.s32.totalorder %s277_s19, %s277_s19 }
  0x10   :  { %p284_p8 = por %p283_p7, %p282_p6 }
  0x12   :  { %p285_p9 = pnand %p284_p8, %p278_p5 }
  0x14   :  { %288 = shalt.err (!%p285_p9)
}
  0x15   :  { %33 = dma.hbm_to_vmem [thread:$0]  %s373_s2, 128, %s31_s15, [#allocation10]  }
  0x16   :  { %309 = dma.done.wait [#allocation7], 128  }
  0x17   :  { %310 = vsyncadd [#allocation7], 4294967168 }
  0x18   :  { %311 = dma.done.wait [#allocation10], 128  }
  0x19   :  { %312 = vsyncadd [#allocation10], 4294967168  ;;  %v52_v0 = vld [vmem:[#allocation9] sm:$0xff]  ;;  %vm54_vm0 = vcmask 261120   ;;  %v51_v1 = vld [vmem:[#allocation6] sm:$0xff]  ;;  %v317_v6 = vmov 0.0   ;;  %v351_v13 = vstv %s371_s0 }
  0x1a   :  { %v59_v2 = vmul.f32 %v52_v0, %v52_v0  ;;  %v53_v3 = vmul.f32 %v51_v1, %v51_v1  ;;  %220 = vmatprep.subr.bf16.mxu0 %v317_v6  ;;  %vm318_vm1 = vmmov 0   ;;  %vm48_vm2 = vcmask 0   ;;  %s319_s24 = smov [#allocation11]  }
  0x1b   :  { %222 = vmatprep.mubr.msk.bf16.mxu0 %vm318_vm1, %v317_v6  ;;  %50 = vst.msk [vmem:[#allocation4] sm:$0x1] %vm48_vm2, %v317_v6  ;;  %49 = vst.msk [vmem:[#allocation3] sm:$0x1] %vm48_vm2, %v317_v6  ;;  %vm46_vm3 = vcmask 57344   ;;  %vm145_vm4 = vcmask 64512  }
  0x1c   :  { %v60_v4 = vsel %vm54_vm0, %v59_v2, 0.0  ;;  %v55_v5 = vsel %vm54_vm0, %v53_v3, 0.0  ;;  %47 = vst.msk [vmem:[#allocation2] sm:$0x1] %vm46_vm3, %v317_v6  ;;  %vm152_vm5 = vcmask 7168   ;;  %s207_s25 = sshll.u32 %s319_s24, 4  ;;  %s208_s25 = int_to_ptr.vmem [resolvable:$true] %s207_s25 }
  0x1d   :  { %61 = vadd.xlane.f32.xlu0 %v60_v4  ;;  %73 = vadd.xlane.f32.xlu1 %v60_v4  ;;  %s289_s26 = scalar_lea.vmem %s208_s25, 16  ;;  %s293_s27 = scalar_lea.vmem %s208_s25, 32 }
  0x1e   :  { %p290_p10 = scmp.ne.s32.totalorder %s208_s25, %s289_s26  ;;  %p294_p11 = scmp.lt.s32.totalorder %s208_s25, %s208_s25 }
  0x1f   :  { %p295_p12 = scmp.lt.s32.totalorder %s293_s27, %s289_s26 }
  0x21   :  { %56 = vadd.xlane.f32.xlu0 %v55_v5  ;;  %p296_p13 = por %p295_p12, %p294_p11 }
  0x22   :  { %v76_v35 = vld [vmem:[#allocation4] sm:$0x1] }
  0x23   :  { %v166_v46 = vld [vmem:[#allocation2] sm:$0x1]  ;;  %p297_p0 = pnand %p296_p13, %p290_p10 }
  0xa6   :  { %v62_v7 = vpop.xlane.xlu0 %61  ;;  %v74_v8 = vpop.xlane.xlu1 %73 }
  0xa7   :  { %237 = vrsqrt.f32 %v62_v7 }
  0xa8   :  { %239 = vrsqrt.f32 %v74_v8 }
  0xaa   :  { %v57_v9 = vpop.xlane.xlu0 %56 }
  0xab   :  { %241 = vrsqrt.f32 %v57_v9  ;;  %v144_v9 = vld [vmem:[#allocation3] sm:$0x1] }
  0xb4   :  { %v238_v10 = vpop.eup %237 }
  0xb5   :  { %v67_v11 = vmul.f32 %v238_v10, %v52_v0  ;;  %v240_v12 = vpop.eup %239 }
  0xb6   :  { %v77_v18 = vmul.f32 %v240_v12, %v52_v0 }
  0xb7   :  { %v94_v14 = vpack.c.bf16 %v67_v11, %v67_v11 }
  0xb8   :  { %v242_v15 = vpop.eup %241 }
  0xb9   :  { %v99_v16 = vsel %vm54_vm0, %v94_v14, 0  ;;  %v65_v17 = vmul.f32 %v242_v15, %v351_v13 }
  0xba   :  { %221 = vmatpush3.bf16.xpose.msra.mxu0 %v99_v16 }
  0xbb   :  { %v66_v19 = vmul.f32 %v65_v17, %v51_v1 }
  0xbd   :  { %v78_v20 = vmul.f32 %v77_v18, %v66_v19  ;;  %v93_v21 = vpack.c.bf16 %v66_v19, %v66_v19 }
  0xbf   :  { %v79_v22 = vsel %vm54_vm0, %v78_v20, 0.0 }
  0xc0   :  { %80 = vadd.xlane.f32.xlu0 %v79_v22 }
  0xc1   :  { %223 = vmatmul.mubr.msk.bf16.vlgmr.msra.gmra.mxu0 %vm54_vm0, %v93_v21 }
 0x149   :  { %v81_v23 = vpop.xlane.xlu0 %80 }
 0x14a   :  { %v82_v24 = vrot.slane %v81_v23, 4 }
 0x14c   :  { %v83_v25 = vadd.f32 %v82_v24, %v81_v23 }
 0x14e   :  { %v84_v26 = vrot.slane %v83_v25, 2 }
 0x150   :  { %v85_v27 = vadd.f32 %v84_v26, %v83_v25 }
 0x152   :  { %v86_v28 = vrot.slane %v85_v27, 1 }
 0x154   :  { %v87_v29 = vadd.f32 %v86_v28, %v85_v27 }
 0x156   :  { %226 = vpush %v87_v29 }
 0x181   :  { %v135_v30 = vpop.f32.mrf.mxu0 }
 0x182   :  { %v141_v31 = vsub.f32 %v135_v30, %v351_v13 }
 0x183   :  { %v224_v32 = vpop.f32.mrf.mxu0 }
 0x184   :  { %v142_v33 = vmul.f32 1.442695, %v141_v31 }
 0x185   :  { %v138_v34 = vpop.f32.mrf.mxu0 }
 0x186   :  { %243 = vpow2.f32 %v142_v33 }
 0x187   :  { %s227_s0 = spop %226  ;;  %v225_v36 = vpop.f32.mrf.mxu0 }
 0x188   :  { %v89_v37 = vstv %s227_s0 }
 0x189   :  { %v90_v38 = vadd.f32 %v89_v37, %v76_v35 }
 0x18b   :  { %92 = vst.msk [vmem:[#allocation4] sm:$0x1] %vm48_vm2, %v90_v38 }
 0x193   :  { %v244_v39 = vpop.eup %243 }
 0x194   :  { %v146_v40 = vsel %vm145_vm4, %v244_v39, 0.0 }
 0x195   :  { %147 = vadd.xlane.f32.xlu1 %v146_v40  ;;  %v167_v41 = vrot.slane %v146_v40, 4 }
 0x197   :  { %v168_v42 = vadd.f32 %v167_v41, %v146_v40 }
 0x199   :  { %v169_v43 = vrot.slane %v168_v42, 2 }
 0x19b   :  { %v170_v44 = vadd.f32 %v169_v43, %v168_v42 }
 0x19d   :  { %v171_v45 = vrot.slane %v170_v44, 1 }
 0x19f   :  { %v172_v47 = vadd.f32 %v171_v45, %v170_v44 }
 0x1a1   :  { %v173_v48 = vadd.f32 %v172_v47, %v166_v46 }
 0x1a3   :  { %175 = vst.msk [vmem:[#allocation2] sm:$0x1] %vm46_vm3, %v173_v48 }
 0x1aa   :  { %v179_v49 = vld [vmem:[#allocation2] sm:$0x1] }
 0x1ab   :  { %245 = vlog2.f32 %v179_v49 }
 0x1b8   :  { %v246_v50 = vpop.eup %245 }
 0x1b9   :  { %v181_v51 = vmul.f32 0.6931472, %v246_v50 }
 0x1bb   :  { %v182_v52 = vadd.f32 %v181_v51, %v351_v13 }
 0x1bd   :  { %v183_v53 = vsel %vm46_vm3, %v182_v52, 0.0 }
 0x1be   :  { %184 = vadd.xlane.f32.xlu0 %v183_v53 }
 0x21e   :  { %v148_v54 = vpop.xlane.xlu1 %147 }
 0x21f   :  { %247 = vlog2.f32 %v148_v54 }
 0x22c   :  { %v248_v55 = vpop.eup %247 }
 0x22d   :  { %v150_v56 = vmul.f32 0.6931472, %v248_v55 }
 0x22f   :  { %v151_v57 = vadd.f32 %v150_v56, %v351_v13  ;;  %v194_v13 = vld [vmem:[#allocation4] sm:$0x1] }
 0x231   :  { %v153_v58 = vsel %vm152_vm5, %v151_v57, 0.0 }
 0x232   :  { %154 = vadd.xlane.f32.xlu1 %v153_v58 }
 0x247   :  { %v185_v59 = vpop.xlane.xlu0 %184 }
 0x248   :  { %v186_v60 = vrot.slane %v185_v59, 4 }
 0x24a   :  { %v187_v61 = vadd.f32 %v186_v60, %v185_v59 }
 0x24c   :  { %v188_v62 = vrot.slane %v187_v61, 2 }
 0x24e   :  { %v189_v2 = vadd.f32 %v188_v62, %v187_v61 }
 0x250   :  { %v190_v5 = vrot.slane %v189_v2, 1 }
 0x252   :  { %v191_v8 = vadd.f32 %v190_v5, %v189_v2 }
 0x2bb   :  { %v155_v63 = vpop.xlane.xlu1 %154 }
 0x2bc   :  { %v156_v0 = vrot.slane %v155_v63, 4 }
 0x2be   :  { %v157_v1 = vadd.f32 %v156_v0, %v155_v63 }
 0x2c0   :  { %v158_v3 = vrot.slane %v157_v1, 2 }
 0x2c2   :  { %v159_v4 = vadd.f32 %v158_v3, %v157_v1 }
 0x2c4   :  { %v160_v6 = vrot.slane %v159_v4, 1 }
 0x2c6   :  { %v161_v7 = vadd.f32 %v160_v6, %v159_v4 }
 0x2c8   :  { %228 = vpush %v161_v7 }
 0x2c9   :  { %230 = vpush %v191_v8 }
 0x2f9   :  { %s229_s22 = spop %228 }
 0x2fa   :  { %v163_v10 = vstv %s229_s22  ;;  %s231_s23 = spop %230 }
 0x2fb   :  { %v164_v11 = vadd.f32 %v163_v10, %v144_v9  ;;  %v193_v12 = vstv %s231_s23 }
 0x2fc   :  { %v197_v16 = vsub.f32 %v193_v12, %v194_v13 }
 0x2fd   :  { %165 = vst.msk [vmem:[#allocation3] sm:$0x1] %vm48_vm2, %v164_v11 }
 0x304   :  { %v195_v14 = vld [vmem:[#allocation3] sm:$0x1] }
 0x305   :  { %v196_v15 = vsub.f32 %v195_v14, %v194_v13 }
 0x307   :  { %v198_v17 = vadd.f32 %v197_v16, %v196_v15 }
 0x309   :  { %v199_v18 = vmul.f32 0.0625, %v198_v17 }
 0x30b   :  { %200 = vst.msk [vmem:[#allocation11] sm:$0x1] %vm48_vm2, %v199_v18 }
 0x30c   :  { %300 = shalt.err (!%p297_p0)
}
 0x30d   :  { %210 = dma.vmem_to_hbm [thread:$0]  %s208_s25, 16, %s374_s3, [#allocation8]  }
 0x30e   :  { %313 = dma.done.wait [#allocation8], 16  }
 0x30f   :  { %314 = vsyncadd [#allocation8], 4294967280 }
 0x310   :  { %214 = vsyncpa [#allocation7], 1 }
 0x311   :  { %215 = vsyncpa [#allocation10], 1 }
 0x312   :  { %216 = vsyncpa [#allocation8], 1 }

</bundles_post_ra>
